<compile_context>
chip_gen: v7x
topology: tpu7x:2x2x1
jax: 0.10.0
libtpu: 0.0.40
codegen_flags: <defaults>
</compile_context>

<pallas_src>
import functools

import jax
import jax.numpy as jnp
from jax.experimental import pallas as pl
from jax.experimental.pallas import tpu as pltpu


def _round_up(x: int, m: int) -> int:
    return ((x + m - 1) // m) * m


def _cdiv(a: int, b: int) -> int:
    return -(-a // b)


def _predictor_kernel(x_ref, w_ref, b_ref, o_ref, acc_ref, *,
                      tk, rem, grid_k, w_resident):
    k = pl.program_id(1)

    @pl.when(k == 0)
    def _init():
        acc_ref[...] = jnp.zeros_like(acc_ref)

    # Weight tile for this K step.
    if w_resident and grid_k > 1:
        off = pl.multiple_of(k * tk, 128)          # tk is a multiple of 128 here
        w_tile = w_ref[:, pl.ds(off, tk)]
    else:
        w_tile = w_ref[...]

    def _accumulate(x_tile):
        # (tm, tk) x (2, tk) contracted on dim 1 -> (tm, 2). The tiny (2, tk)
        # operand is the one Mosaic stages/transposes for the MXU (cheap);
        # the large x tile is consumed in its natural layout.
        acc_ref[...] += jax.lax.dot_general(
            x_tile,
            w_tile,
            dimension_numbers=(((1,), (1,)), ((), ())),
            preferred_element_type=jnp.float32,
        )

    if rem == 0:
        _accumulate(x_ref[...])
    else:
        # Ragged last K tile: columns >= rem hold unspecified boundary VMEM and
        # MUST be zeroed (zero weight pad columns are not enough: NaN*0 == NaN).
        @pl.when(k < grid_k - 1)
        def _full():
            _accumulate(x_ref[...])

        @pl.when(k == grid_k - 1)
        def _masked():
            xv = x_ref[...]
            col = jax.lax.broadcasted_iota(jnp.int32, xv.shape, 1)
            _accumulate(jnp.where(col < rem, xv, jnp.zeros_like(xv)))

    @pl.when(k == grid_k - 1)
    def _finalize():
        acc = acc_ref[...]                                        # (tm, 2) f32
        # Bias add from SMEM scalars (select on the lane index, VPU-only).
        col = jax.lax.broadcasted_iota(jnp.int32, acc.shape, 1)
        logits = acc + jnp.where(col == 0, b_ref[0], b_ref[1])
        logits = jnp.maximum(logits, -1.0)                        # .clamp(min=-1)
        # Closed-form 2-class log-softmax: lse = max(a,b) + log(1 + exp(-|a-b|)).
        a = logits[:, 0:1]
        c = logits[:, 1:2]
        lse = jnp.maximum(a, c) + jnp.log(1.0 + jnp.exp(-jnp.abs(a - c)))
        o_ref[...] = (logits - lse).astype(o_ref.dtype)


def simple_uncertainty_predictor(feature_vec, weight, bias):
    """feature_vec: (B, V); weight: (2, V) (PyTorch nn.Linear layout); bias: (2,).

    Returns (B, 2) log-probabilities (log_softmax over dim 1).
    """
    B, V = feature_vec.shape
    assert weight.shape == (2, V)
    assert bias.shape == (2,)

    # Keep the caller's narrow dtype (bf16 halves x HBM traffic); anything else
    # runs in f32. Accumulation is always f32.
    if feature_vec.dtype not in (jnp.dtype(jnp.float32), jnp.dtype(jnp.bfloat16)):
        feature_vec = feature_vec.astype(jnp.float32)
    x = feature_vec
    itemsize = x.dtype.itemsize

    # --- tile selection: grow the lane (contiguous K) dim before the sublane dim.
    if V % 128 == 0:
        tk = min(4096, V)
    else:
        tk = min(4096, _round_up(V, 128))
        if tk >= V:              # small / unaligned vocab: one full-width block
            tk = V               # ("block dim == array dim" is always legal)
    rem = V % tk                 # valid columns in the last K tile (0 => full)

    tm = min(512, _round_up(B, 8))
    # v7x: ensure >= 2 batch tiles so the "parallel" i axis spans both
    # TensorCores (no-op when the batch is too small to split).
    if _cdiv(B, tm) < 2 and tm > 8:
        tm = max(8, _round_up(_cdiv(B, 2), 8))

    grid_i = _cdiv(B, tm)
    grid_k = _cdiv(V, tk)
    v_pad = grid_k * tk

    # Tiny (2, V) weight: cast to the compute dtype and zero-pad to a K-tile
    # multiple (so weight blocks never contain garbage); negligible cost.
    w = weight.astype(x.dtype)
    if v_pad != V:
        w = jnp.pad(w, ((0, 0), (0, v_pad - V)))

    # Keep the weight VMEM-resident (fetched once, constant index_map) unless
    # the vocab is huge; otherwise stream (2, tk) tiles.
    w_resident = 8 * v_pad * itemsize <= 4 * 1024 * 1024
    if w_resident:
        w_spec = pl.BlockSpec((2, v_pad), lambda i, k: (0, 0))
    else:
        w_spec = pl.BlockSpec((2, tk), lambda i, k: (0, k))

    # VMEM budget: double-buffered x tile + weight + lane-padded out/acc blocks.
    x_tile_bytes = tm * tk * itemsize
    w_vmem = 8 * v_pad * itemsize if w_resident else 2 * 8 * tk * itemsize
    small = 3 * tm * 128 * 4
    vmem_limit = min(100 * 1024 * 1024,
                     max(32 * 1024 * 1024,
                         (2 * x_tile_bytes + w_vmem + small) * 3 // 2))

    cost = pl.CostEstimate(
        flops=4 * B * V,                                   # 2 * M * N * K, N = 2
        transcendentals=2 * B,                             # exp + log per row
        bytes_accessed=(B * V * itemsize
                        + (1 if w_resident else grid_i) * 2 * v_pad * itemsize
                        + B * 2 * itemsize + 2 * 4),
    )

    kernel = functools.partial(_predictor_kernel, tk=tk, rem=rem,
                               grid_k=grid_k, w_resident=w_resident)

    return pl.pallas_call(
        kernel,
        out_shape=jax.ShapeDtypeStruct((B, 2), x.dtype),
        grid_spec=pltpu.PrefetchScalarGridSpec(
            num_scalar_prefetch=0,
            grid=(grid_i, grid_k),
            in_specs=[
                pl.BlockSpec((tm, tk), lambda i, k: (i, k)),          # x tile
                w_spec,                                               # weight
                pl.BlockSpec(memory_space=pltpu.MemorySpace.SMEM),    # bias
            ],
            out_specs=pl.BlockSpec((tm, 2), lambda i, k: (i, 0)),     # resident over k
            scratch_shapes=[pltpu.VMEM((tm, 2), jnp.float32)],
        ),
        compiler_params=pltpu.CompilerParams(
            dimension_semantics=("parallel", "arbitrary"),
            vmem_limit_bytes=vmem_limit,
        ),
        cost_estimate=cost,
    )(x, w, bias.astype(jnp.float32))


def _reference(feature_vec, weight, bias):
    logits = jnp.maximum(feature_vec @ weight.T + bias, -1.0)
    return jax.nn.log_softmax(logits, axis=1)


if __name__ == "__main__":
    key = jax.random.PRNGKey(0)
    k_x, k_w, k_b = jax.random.split(key, 3)

    batch = 8
    vocab_size = 32

    # Deterministic parameter init (PyTorch-style uniform(-1/sqrt(V), 1/sqrt(V))).
    bound = 1.0 / jnp.sqrt(jnp.float32(vocab_size))
    weight = jax.random.uniform(k_w, (2, vocab_size), jnp.float32, -bound, bound)
    bias = jax.random.uniform(k_b, (2,), jnp.float32, -bound, bound)

    feature_vec = jax.random.uniform(k_x, (batch, vocab_size), jnp.float32, 0.0, 2.0)

    out = simple_uncertainty_predictor(feature_vec, weight, bias)
    out = jax.block_until_ready(out)

    ref = _reference(feature_vec, weight, bias)
    assert out.shape == (batch, 2)
    assert jnp.allclose(out, ref, atol=1e-5, rtol=1e-5), (out, ref)

    # TODO(synk): return_all_layers=True branch (pre-softmax logits) not exposed;
    # only the default forward path (log_softmax) is returned.
    print("KERNEL_OK")
</pallas_src>

<mosaic_0001>
module attributes {stable_mosaic.version = 11 : i64} {
  func.func @_predictor_kernel(%arg0: i32, %arg1: i32, %arg2: memref<8x32xf32, #tpu.memory_space<vmem>>, %arg3: memref<2x32xf32, #tpu.memory_space<vmem>>, %arg4: memref<2xf32, #tpu.memory_space<smem>>, %arg5: memref<8x2xf32, #tpu.memory_space<vmem>>, %arg6: memref<8x2xf32, #tpu.memory_space<vmem>>) attributes {dimension_semantics = [#tpu.dimension_semantics<parallel>, #tpu.dimension_semantics<arbitrary>], iteration_bounds = array<i64: 1, 1>, scalar_prefetch = 0 : i64, scratch_operands = 1 : i64, tpu.core_type = #tpu.core_type<tc>, window_params = [{transform_indices = @transform_0, window_bounds = array<i64: 8, 32>}, {pipeline_mode = #tpu.pipeline_mode<synchronous>, transform_indices = @transform_1, window_bounds = array<i64: 2, 32>}, {transform_indices = @transform_2, window_bounds = array<i64: 2>}, {transform_indices = @transform_3, window_bounds = array<i64: 8, 2>}]} {
    %c0_i32 = arith.constant 0 : i32
    %0 = arith.cmpi eq, %arg1, %c0_i32 : i32
    %1 = arith.extui %0 : i1 to i32
    %c0_i32_0 = arith.constant 0 : i32
    %2 = arith.cmpi ne, %1, %c0_i32_0 : i32
    scf.if %2 {
      %cst_10 = arith.constant 0.000000e+00 : f32
      %12 = vector.broadcast %cst_10 : f32 to vector<8x2xf32>
      %c0_11 = arith.constant 0 : index
      %c0_12 = arith.constant 0 : index
      %13 = vector.load %arg6[%c0_11, %c0_12] : memref<8x2xf32, #tpu.memory_space<vmem>>, vector<8x2xf32>
      tpu.vector_store %arg6[%c0_11, %c0_12], %12 {strides = array<i32>} : memref<8x2xf32, #tpu.memory_space<vmem>>, vector<8x2xf32>,
    } else {
    }
    %c0 = arith.constant 0 : index
    %c0_1 = arith.constant 0 : index
    %3 = vector.load %arg3[%c0, %c0_1] : memref<2x32xf32, #tpu.memory_space<vmem>>, vector<2x32xf32>
    %c0_2 = arith.constant 0 : index
    %c0_3 = arith.constant 0 : index
    %4 = vector.load %arg2[%c0_2, %c0_3] : memref<8x32xf32, #tpu.memory_space<vmem>>, vector<8x32xf32>
    %c0_4 = arith.constant 0 : index
    %c0_5 = arith.constant 0 : index
    %5 = vector.load %arg6[%c0_4, %c0_5] : memref<8x2xf32, #tpu.memory_space<vmem>>, vector<8x2xf32>
    %cst = arith.constant dense<0.000000e+00> : vector<8x2xf32>
    %6 = tpu.matmul %4, %3, %cst {dimension_numbers = #tpu.dot_dimension_numbers<[1], [1], [0], [0], [0, 0, 1, 0], [], []>} : vector<8x32xf32>, vector<2x32xf32>, vector<8x2xf32> -> vector<8x2xf32>
    %7 = arith.addf %5, %6 : vector<8x2xf32>
    %c0_6 = arith.constant 0 : index
    %c0_7 = arith.constant 0 : index
    %8 = vector.load %arg6[%c0_6, %c0_7] : memref<8x2xf32, #tpu.memory_space<vmem>>, vector<8x2xf32>
    tpu.vector_store %arg6[%c0_6, %c0_7], %7 {strides = array<i32>} : memref<8x2xf32, #tpu.memory_space<vmem>>, vector<8x2xf32>,
    %c0_i32_8 = arith.constant 0 : i32
    %9 = arith.cmpi eq, %arg1, %c0_i32_8 : i32
    %10 = arith.extui %9 : i1 to i32
    %c0_i32_9 = arith.constant 0 : i32
    %11 = arith.cmpi ne, %10, %c0_i32_9 : i32
    scf.if %11 {
      %c0_10 = arith.constant 0 : index
      %c0_11 = arith.constant 0 : index
      %12 = vector.load %arg6[%c0_10, %c0_11] : memref<8x2xf32, #tpu.memory_space<vmem>>, vector<8x2xf32>
      %13 = tpu.iota {dimensions = array<i32: 1>} : vector<8x2xi32>
      %c0_i32_12 = arith.constant 0 : i32
      %14 = vector.broadcast %c0_i32_12 : i32 to vector<8x2xi32>
      %15 = arith.cmpi eq, %13, %14 : vector<8x2xi32>
      %c0_13 = arith.constant 0 : index
      %16 = memref.load %arg4[%c0_13] : memref<2xf32, #tpu.memory_space<smem>>
      %c1 = arith.constant 1 : index
      %17 = memref.load %arg4[%c1] : memref<2xf32, #tpu.memory_space<smem>>
      %18 = vector.broadcast %16 : f32 to vector<8x2xf32>
      %19 = vector.broadcast %17 : f32 to vector<8x2xf32>
      %20 = arith.select %15, %18, %19 : vector<8x2xi1>, vector<8x2xf32>
      %21 = arith.addf %12, %20 : vector<8x2xf32>
      %cst_14 = arith.constant -1.000000e+00 : f32
      %22 = vector.broadcast %cst_14 : f32 to vector<8x2xf32>
      %23 = arith.maximumf %21, %22 : vector<8x2xf32>
      %24 = vector.extract_strided_slice %23 {offsets = [0, 0], sizes = [8, 1], strides = [1, 1]} : vector<8x2xf32> to vector<8x1xf32>
      %25 = vector.extract_strided_slice %23 {offsets = [0, 1], sizes = [8, 1], strides = [1, 1]} : vector<8x2xf32> to vector<8x1xf32>
      %26 = arith.maximumf %24, %25 : vector<8x1xf32>
      %27 = arith.subf %24, %25 : vector<8x1xf32>
      %28 = math.absf %27 : vector<8x1xf32>
      %cst_15 = arith.constant 0.000000e+00 : f32
      %29 = vector.broadcast %cst_15 : f32 to vector<8x1xf32>
      %30 = arith.subf %29, %28 : vector<8x1xf32>
      %31 = math.exp %30 : vector<8x1xf32>
      %cst_16 = arith.constant 1.000000e+00 : f32
      %32 = vector.broadcast %cst_16 : f32 to vector<8x1xf32>
      %33 = arith.addf %32, %31 : vector<8x1xf32>
      %34 = math.log %33 : vector<8x1xf32>
      %35 = arith.addf %26, %34 : vector<8x1xf32>
      %36 = vector.broadcast %35 : vector<8x1xf32> to vector<8x2xf32>
      %37 = arith.subf %23, %36 : vector<8x2xf32>
      %c0_17 = arith.constant 0 : index
      %c0_18 = arith.constant 0 : index
      %38 = vector.load %arg5[%c0_17, %c0_18] : memref<8x2xf32, #tpu.memory_space<vmem>>, vector<8x2xf32>
      tpu.vector_store %arg5[%c0_17, %c0_18], %37 {strides = array<i32>} : memref<8x2xf32, #tpu.memory_space<vmem>>, vector<8x2xf32>,
    } else {
    }
    return
  }
  func.func @transform_0(%arg0: i32, %arg1: i32) -> (i32, i32) {
    %c0_i32 = arith.constant 0 : i32
    return %arg0, %arg1 : i32, i32
  }
  func.func @transform_1(%arg0: i32, %arg1: i32) -> (i32, i32) {
    %c0_i32 = arith.constant 0 : i32
    %c0_i32_0 = arith.constant 0 : i32
    %c0_i32_1 = arith.constant 0 : i32
    return %c0_i32, %c0_i32_0 : i32, i32
  }
  func.func @transform_2(%arg0: i32, %arg1: i32) -> i32 {
    %c0_i32 = arith.constant 0 : i32
    %c0_i32_0 = arith.constant 0 : i32
    return %c0_i32 : i32
  }
  func.func @transform_3(%arg0: i32, %arg1: i32) -> (i32, i32) {
    %c0_i32 = arith.constant 0 : i32
    %c0_i32_0 = arith.constant 0 : i32
    return %arg0, %c0_i32 : i32, i32
  }
}

</mosaic_0001>

<bundles_post_ra>
// kernel: tpu_custom_call.1
= control target key start
LH: loop header
LB: loop body
LE: loop exit
PB: predicated region body
PF: predicated region fallthrough
CT: control target
= control target key end

     0   :  { %8 = vsyncpa [#allocation4], 0  ;;  %s278_s0 = inlined_call_operand.hbm [shape: f32[8,32], index: 0, kind: input, shape index: {}]   ;;  %s279_s1 = inlined_call_operand.vmem [shape: f32[2,32], index: 1, kind: input, shape index: {}]   ;;  %s280_s2 = inlined_call_operand.vmem [shape: f32[2], index: 2, kind: input, shape index: {}]   ;;  %s281_s3 = inlined_call_operand.vmem [shape: f32[8,2], index: 3, kind: output, shape index: {}]  }
   0x1   :  { %9 = vsyncpa [#allocation5], 0  ;;  %s28_s14 = sshll.u32 %s280_s2, 4  ;;  %s228_s15 = smov [#allocation3]   ;;  %s29_s14 = int_to_ptr.vmem [resolvable:$true] %s28_s14 }
   0x2   :  { %s16_s16 = sshll.u32 %s228_s15, 4  ;;  %s190_s19 = scalar_lea.hbm %s278_s0, 128  ;;  %s17_s16 = int_to_ptr.vmem [resolvable:$true] %s16_s16 }
   0x3   :  { %p191_p0 = scmp.ne.s32.totalorder %s278_s0, %s190_s19  ;;  %p194_p1 = scmp.lt.u32.totalorder %s190_s19, %s278_s0 }
   0x5   :  { %p196_p2 = pnand %p194_p1, %p191_p0 }
   0x7   :  { %199 = shalt.err (!%p196_p2)
}
   0x8   :  { %s200_s24 = scalar_lea.vmem %s17_s16, 128  ;;  %p205_p4 = scmp.lt.s32.totalorder %s17_s16, %s17_s16 }
   0x9   :  { %p201_p3 = scmp.ne.s32.totalorder %s17_s16, %s200_s24  ;;  %p206_p5 = scmp.lt.s32.totalorder %s200_s24, %s200_s24 }
   0xb   :  { %p207_p6 = por %p206_p5, %p205_p4 }
   0xd   :  { %p208_p7 = pnand %p207_p6, %p201_p3 }
   0xf   :  { %211 = shalt.err (!%p208_p7)
}
  0x10   :  { %19 = dma.hbm_to_vmem [thread:$0]  %s278_s0, 128, %s17_s16, [#allocation4]  }
  0x11   :  { %s212_s26 = scalar_lea.vmem %s29_s14, 16  ;;  %p217_p9 = scmp.lt.s32.totalorder %s29_s14, %s29_s14 }
  0x12   :  { %p213_p8 = scmp.ne.s32.totalorder %s29_s14, %s212_s26  ;;  %p218_p10 = scmp.lt.s32.totalorder %s212_s26, %s212_s26 }
  0x14   :  { %p219_p11 = por %p218_p10, %p217_p9 }
  0x16   :  { %p220_p12 = pnand %p219_p11, %p213_p8 }
  0x18   :  { %223 = shalt.err (!%p220_p12)
}
  0x19   :  { %s229_s27 = smov [#allocation6]  }
  0x1a   :  { %31 = dma.vmem_to_smem %s29_s14, 16, %s229_s27, [#allocation5]  }
  0x1b   :  { %224 = dma.done.wait [#allocation4], 128  }
  0x1c   :  { %225 = vsyncadd [#allocation4], 4294967168 }
  0x1d   :  { %226 = dma.done.wait [#allocation5], 16  }
  0x1e   :  { %227 = vsyncadd [#allocation5], 4294967280 }
  0x1f   :  { %38 = sfence }
  0x20   :  { %vm43_vm0 = vcmask 15360   ;;  %v45_v0 = vld [vmem:[%s279_s1] sm:$0x3]  ;;  %vm48_vm1 = vcmask 261120   ;;  %v230_v1 = vmov 0.0   ;;  %vm231_vm2 = vmmov 0  }
  0x21   :  { %44 = vst.msk [vmem:[#allocation2] sm:$0xff] %vm43_vm0, %v230_v1  ;;  %174 = vmatprep.subr.mxu0 %v230_v1  ;;  %176 = vmatprep.mubr.msk.f32.mxu0 %vm231_vm2, %v230_v1  ;;  %v46_v2 = vld [vmem:[#allocation3] sm:$0xff]  ;;  %v132_v3 = vlaneseq  ;;  %s135_s0 = sld [smem:[#allocation6]]  ;;  %s171_s30 = sld [smem:[#allocation6 + $0x1]]  ;;  %v233_v15 = vmov 0  }
  0x22   :  { %175 = vmatpush3.xpose.msk.msra.mxu0 %vm48_vm1, %v45_v0  ;;  %s232_s1 = smov 127   ;;  %185 = vset.pattern.permute.xlu0 %v233_v15 }
  0x23   :  { %v133_v8 = vand.u32 127, %v132_v3 }
  0x25   :  { %177 = vmatmul.mubr.msk.f32.vlgmr.msra.gmra.mrb[0].mxu0 %vm48_vm1, %v46_v2  ;;  %vm134_vm3 = vcmp.eq.s32.totalorder %v133_v8, 0 }
  0x27   :  { %v137_v9 = vstv %s135_s0  ;;  %v138_v10 = vstv %s171_s30 }
  0x28   :  { %v47_v4 = vld [vmem:[#allocation2] sm:$0xff]  ;;  %v139_v11 = vsel %vm134_vm3, %v137_v9, %v138_v10 }
  0xf8   :  { %v121_v5 = vpop.f32.mrb[0].mxu0 }
  0xf9   :  { %v125_v6 = vadd.f32 %v121_v5, %v47_v4  ;;  %v178_v7 = vpop.f32.mrb[1].mxu0 }
  0xfb   :  { %127 = vst.msk [vmem:[#allocation2] sm:$0xff] %vm43_vm0, %v125_v6 }
 0x102   :  { %v131_v12 = vld [vmem:[#allocation2] sm:$0xff] }
 0x103   :  { %v140_v13 = vadd.f32 %v139_v11, %v131_v12 }
 0x105   :  { %v141_v14 = vmax.f32 %v140_v13, -1.0 }
 0x107   :  { %143 = vrot.lane.b32.xlu0 %v141_v14, %s232_s1 }
 0x179   :  { %v144_v16 = vpop.permute.xlu0 %143 }
 0x17a   :  { %v147_v17 = vsub.f32 %v141_v14, %v144_v16  ;;  %v146_v24 = vmax.f32 %v141_v14, %v144_v16 }
 0x17c   :  { %v148_v18 = vand.u32 2147483647, %v147_v17 }
 0x17e   :  { %v149_v19 = vsub.f32 0.0, %v148_v18 }
 0x180   :  { %v150_v20 = vmul.f32 1.442695, %v149_v19 }
 0x182   :  { %186 = vpow2.f32 %v150_v20 }
 0x18c   :  { %v187_v21 = vpop.eup %186 }
 0x18d   :  { %v152_v22 = vadd.f32 1.0, %v187_v21 }
 0x18f   :  { %188 = vlog2.f32 %v152_v22 }
 0x199   :  { %v189_v23 = vpop.eup %188 }
 0x19a   :  { %v154_v25 = vmul.f32 0.6931472, %v189_v23 }
 0x19c   :  { %v155_v26 = vadd.f32 %v154_v25, %v146_v24 }
 0x19e   :  { %158 = vperm.xlu0 %185, %v155_v26  }
 0x21d   :  { %v159_v27 = vpop.permute.xlu0 %158 }
 0x21e   :  { %v161_v28 = vsub.f32 %v141_v14, %v159_v27 }
 0x220   :  { %162 = vst.msk [vmem:[%s281_s3] sm:$0xff] %vm43_vm0, %v161_v28 }
 0x221   :  { %167 = vsyncpa [#allocation4], 1 }
 0x222   :  { %168 = vsyncpa [#allocation5], 1 }

</bundles_post_ra>
